<compile_context>
chip_gen: v6e
topology: v6e:2x2x1
jax: 0.10.0
libtpu: 0.0.40
codegen_flags: <defaults>
</compile_context>

<pallas_src>
import jax
import jax.numpy as jnp
from jax.experimental import pallas as pl
from jax.experimental.pallas import tpu as pltpu

MC_IMAGE_MEAN = (0.3331, 0.3245, 0.3051)
MC_IMAGE_STD = (0.2439, 0.2493, 0.2873)


def _round_up(x, m):
    return ((x + m - 1) // m) * m


def _legal_tb(cand, B, L, row_budget):
    """Batch tile legality: respects row budget and min-tile rules."""
    rows = cand * L
    if rows > row_budget:
        return False
    if cand == B:
        return True  # full first dim is exempt from the min-tile rule
    # f32 output block (tb, D_pad) needs tb % 8 == 0; uint8 pixel block
    # (tb*L, tk) needs rows % 32 == 0.
    return cand % 8 == 0 and rows % 32 == 0


def _plan_tiles(B, L, K, F_pad, D_pad, *, target_batch_tiles=1,
                row_budget=1024, max_tk=16384, vmem_target=36 << 20):
    """Pick (tb, tk, n_b, n_k, vmem_limit_bytes).

    - n_b is kept as small as possible (1 on single-TC v5e/v6e) so the folded
      encoder weight streams from HBM exactly once; pass target_batch_tiles=2
      on v7x to occupy both TensorCores via the "parallel" batch axis.
    - tk is the largest multiple of 128 dividing K whose double-buffered
      working set stays under vmem_target.
    """
    # --- batch tile ---
    tb = None
    if B % target_batch_tiles == 0 and _legal_tb(B // target_batch_tiles, B, L, row_budget):
        tb = B // target_batch_tiles
    if tb is None and _legal_tb(B, B, L, row_budget):
        tb = B
    if tb is None:
        for cand in range(B, 0, -1):
            if B % cand == 0 and _legal_tb(cand, B, L, row_budget):
                tb = cand
                break
    if tb is None:
        tb = B  # give up on the row budget rather than emit an illegal tile
    rows = tb * L
    n_b = B // tb

    # --- K tile ---
    def working_set(tk_):
        px = 2 * rows * tk_                      # uint8 pixel block, double-buffered
        w = 2 * tk_ * F_pad * 2                  # bf16 folded encoder weight, x2 buffers
        tmp = rows * tk_ * 4                     # in-kernel cast / pooling temp (worst case)
        acc = rows * F_pad * 4                   # f32 accumulator scratch (upper bound)
        epi = 2 * (F_pad * F_pad * 2 + F_pad * D_pad * 2 + 3 * F_pad * 4 + D_pad * 4)
        out = 2 * tb * D_pad * 4
        return px + w + tmp + acc + epi + out

    if K % 128 != 0 or (K <= max_tk and working_set(K) <= vmem_target):
        tk = K
    else:
        tk = None
        start = min(max_tk, K)
        start -= start % 128
        for cand in range(start, 127, -128):
            if K % cand == 0 and working_set(cand) <= vmem_target:
                tk = cand
                break
        if tk is None:
            tk = 128  # K % 128 == 0 here, so this always divides K
    n_k = K // tk

    need = working_set(tk)
    # Headroom for compiler-internal scratch; never claim all of v7x's 64 MiB.
    vmem_limit = int(min(max(int(need * 1.5) + (4 << 20), 24 << 20), 48 << 20))
    return tb, tk, n_b, n_k, vmem_limit


# ---------------------------------------------------------------------------
# Fused kernel: [B*L, K] raw uint8 pixels -> rewards [B, D_pad]
#   grid = (batch tiles, K tiles); K is the reduction axis with an f32 VMEM
#   accumulator; temporal pooling + temporal/reward linears run in a pl.when
#   epilogue at the last K step.
# ---------------------------------------------------------------------------
def _fused_forward(frames, params, B, L, pool_pixels_first):
    N, K = frames.shape  # N = B*L, B-major / L-minor row order
    w_img, b_img = params["w_img_eff"], params["b_img_eff"]  # [K,F_pad] bf16, [1,F_pad] f32
    w_t, b_t = params["w_t"], params["b_t"]                  # [F_pad,F_pad] bf16, [1,F_pad] f32
    w_r, b_r = params["w_r"], params["b_r"]                  # [F_pad,D_pad] bf16, [1,D_pad] f32
    F_pad = w_img.shape[1]
    D_pad = w_r.shape[1]

    tb, tk, n_b, n_k, vmem_limit = _plan_tiles(B, L, K, F_pad, D_pad)
    rows = tb * L
    acc_rows = tb if pool_pixels_first else rows

    def kernel(px_ref, wimg_ref, bimg_ref, wt_ref, bt_ref, wr_ref, br_ref,
               o_ref, acc_ref):
        ki = pl.program_id(1)

        @pl.when(ki == 0)
        def _init():
            acc_ref[...] = jnp.zeros_like(acc_ref)

        if pool_pixels_first:
            # Valid only because the synthetic image encoder is linear: the
            # mean over L commutes with the encoder matmul (L x fewer MXU
            # FLOPs, L x smaller accumulator).  Pool in f32 (exact for uint8).
            xp = jnp.mean(px_ref[...].astype(jnp.float32).reshape(tb, L, tk), axis=1)
            x = xp.astype(jnp.bfloat16)                       # [tb, tk]
        else:
            # Direct uint8 -> bf16 (0..255 exact in bf16); /255, mean and std
            # are folded into w_img_eff / b_img_eff (zero per-pixel VPU math).
            x = px_ref[...].astype(jnp.bfloat16)              # [rows, tk]
        acc_ref[...] += jnp.dot(x, wimg_ref[...],
                                preferred_element_type=jnp.float32)

        @pl.when(ki == n_k - 1)
        def _epilogue():
            feats = acc_ref[...] + bimg_ref[...]
            if pool_pixels_first:
                pooled = feats                                        # [tb, F_pad]
            else:
                pooled = jnp.mean(feats.reshape(tb, L, F_pad), axis=1)  # [tb, F_pad]
            video = jnp.dot(pooled, wt_ref[...],
                            preferred_element_type=jnp.float32) + bt_ref[...]
            rewards = jnp.dot(video, wr_ref[...],
                              preferred_element_type=jnp.float32) + br_ref[...]
            o_ref[...] = rewards

    if pool_pixels_first:
        flops = 2 * B * K * F_pad + N * K
    else:
        flops = 2 * N * K * F_pad
    flops += 2 * B * F_pad * F_pad + 2 * B * F_pad * D_pad
    bytes_accessed = (N * K * frames.dtype.itemsize
                      + n_b * K * F_pad * 2
                      + F_pad * F_pad * 2 + F_pad * D_pad * 2
                      + (3 * F_pad + 2 * D_pad) * 4 + B * D_pad * 4)

    return pl.pallas_call(
        kernel,
        out_shape=jax.ShapeDtypeStruct((B, D_pad), jnp.float32),
        grid=(n_b, n_k),
        in_specs=[
            pl.BlockSpec((rows, tk), lambda b, k: (b, k)),       # pixels (uint8)
            pl.BlockSpec((tk, F_pad), lambda b, k: (k, 0)),      # folded encoder W (bf16)
            pl.BlockSpec((1, F_pad), lambda b, k: (0, 0)),       # folded encoder b (f32)
            pl.BlockSpec((F_pad, F_pad), lambda b, k: (0, 0)),   # temporal W (bf16)
            pl.BlockSpec((1, F_pad), lambda b, k: (0, 0)),       # temporal b (f32)
            pl.BlockSpec((F_pad, D_pad), lambda b, k: (0, 0)),   # reward W (bf16)
            pl.BlockSpec((1, D_pad), lambda b, k: (0, 0)),       # reward b (f32)
        ],
        out_specs=pl.BlockSpec((tb, D_pad), lambda b, k: (b, 0)),
        scratch_shapes=[pltpu.VMEM((acc_rows, F_pad), jnp.float32)],
        compiler_params=pltpu.CompilerParams(
            dimension_semantics=("parallel", "arbitrary"),
            vmem_limit_bytes=vmem_limit,
        ),
        cost_estimate=pl.CostEstimate(
            flops=flops, transcendentals=0, bytes_accessed=bytes_accessed),
    )(frames, w_img, b_img, w_t, b_t, w_r, b_r)


# ---------------------------------------------------------------------------
# Reward head only (is_video_features=True path)
# ---------------------------------------------------------------------------
def _reward_head_kernel(vf_ref, wr_ref, br_ref, o_ref):
    o_ref[...] = (
        jnp.dot(vf_ref[...], wr_ref[...], preferred_element_type=jnp.float32)
        + br_ref[...]
    )


def reward_head(video_feats, params):
    B, F = video_feats.shape
    w_r, b_r = params["w_r"], params["b_r"]
    F_pad, D_pad = w_r.shape
    vf = video_feats.astype(jnp.float32)
    if F < F_pad:
        vf = jnp.pad(vf, ((0, 0), (0, F_pad - F)))  # padded rows of w_r are zero
    vmem = pl.BlockSpec(memory_space=pltpu.MemorySpace.VMEM)
    out = pl.pallas_call(
        _reward_head_kernel,
        out_shape=jax.ShapeDtypeStruct((B, D_pad), jnp.float32),
        in_specs=[vmem, vmem, vmem],
        out_specs=vmem,
    )(vf, w_r, b_r)
    return out[:, : params["D"]]


# ---------------------------------------------------------------------------
# VideoRewardBase.forward equivalent
# ---------------------------------------------------------------------------
def video_reward_forward(videos, params, is_video_features=False,
                         pool_pixels_first=False):
    """videos: [B, L, C, H, W] raw uint8 pixels, or [B, F] video features.

    pool_pixels_first=True exploits the linearity of the synthetic image
    encoder (mean over L before the encoder matmul); keep it False for the
    faithful per-frame-encoding semantics / non-linear encoders.
    """
    # TODO(synk): text_tokens reward head (CLIP-style video-text similarity)
    # and load_ckpt are not implemented; the synthetic linear head is used.
    if is_video_features:
        assert videos.ndim == 2
        return reward_head(videos, params)

    assert videos.ndim == 5, "video must be 5D (raw pixels)"
    B, L, C, H, W = videos.shape
    K = C * H * W
    # Keep the native uint8 pixel dtype into the kernel (4x less HBM traffic
    # than a wrapper-side f32 cast).  Row-major NCHW flatten (B-major, L-minor).
    frames = videos.reshape(B * L, K)
    out = _fused_forward(frames, params, B, L, pool_pixels_first)
    return out[:, : params["D"]]


# ---------------------------------------------------------------------------
# Synthetic parameters with the normalization folded into the image encoder.
# ---------------------------------------------------------------------------
def make_params(key, C, H, W, F, D):
    K = C * H * W
    F_pad = _round_up(F, 128)
    D_pad = _round_up(D, 128)
    k1, k2, k3, k4, k5, k6 = jax.random.split(key, 6)

    # channel-major broadcast matching the row-major NCHW flatten
    mean_vec = jnp.repeat(jnp.asarray(MC_IMAGE_MEAN, jnp.float32), H * W)       # [K]
    inv_std_vec = jnp.repeat(1.0 / jnp.asarray(MC_IMAGE_STD, jnp.float32), H * W)

    w_img = jax.random.normal(k1, (K, F), jnp.float32) / jnp.sqrt(K)
    b_img = jax.random.normal(k2, (F,), jnp.float32) * 0.01
    w_t = jax.random.normal(k3, (F, F), jnp.float32) / jnp.sqrt(F)
    b_t = jax.random.normal(k4, (F,), jnp.float32) * 0.01
    w_r = jax.random.normal(k5, (F, D), jnp.float32) / jnp.sqrt(F)
    b_r = jax.random.normal(k6, (D,), jnp.float32) * 0.01

    # Fold basic_image_tensor_preprocess into the linear encoder:
    #   ((x/255 - mean) * inv_std) @ W + b
    # = x @ (W * (inv_std/255)[:,None]) + (b - (mean*255) @ W_eff)
    # The bias is folded with the *bf16-rounded* effective weights so the
    # kernel is self-consistent (no systematic bias from weight rounding).
    w_img_eff = (w_img * (inv_std_vec / 255.0)[:, None]).astype(jnp.bfloat16)   # [K,F]
    b_img_eff = b_img - (mean_vec * 255.0) @ w_img_eff.astype(jnp.float32)      # [F]

    def pad2(a, r, c):
        return jnp.pad(a, ((0, r - a.shape[0]), (0, c - a.shape[1])))

    def pad_row(a, c):
        return jnp.pad(a, (0, c - a.shape[0])).reshape(1, c)

    params = {
        "w_img_eff": pad2(w_img_eff, K, F_pad),                       # bf16
        "b_img_eff": pad_row(b_img_eff, F_pad),                       # f32
        "w_t": pad2(w_t, F_pad, F_pad).astype(jnp.bfloat16),
        "b_t": pad_row(b_t, F_pad),
        "w_r": pad2(w_r, F_pad, D_pad).astype(jnp.bfloat16),
        "b_r": pad_row(b_r, D_pad),
        "F": F,
        "D": D,
    }
    ref_params = {
        "mean_vec": mean_vec, "inv_std_vec": inv_std_vec,
        "w_img": w_img, "b_img": b_img,
        "w_t": w_t, "b_t": b_t, "w_r": w_r, "b_r": b_r,
    }
    return params, ref_params


def reference_forward(videos, rp):
    """Pure-JAX reference matching the original (unfolded, f32) math."""
    B, L, C, H, W = videos.shape
    K = C * H * W
    x = videos.reshape(B * L, K).astype(jnp.float32) / 255.0
    xn = (x - rp["mean_vec"][None, :]) * rp["inv_std_vec"][None, :]
    feats = xn @ rp["w_img"] + rp["b_img"][None, :]
    pooled = feats.reshape(B, L, -1).mean(axis=1)
    video = pooled @ rp["w_t"] + rp["b_t"][None, :]
    return video @ rp["w_r"] + rp["b_r"][None, :]


if __name__ == "__main__":
    # MineCLIP-style toy shapes: 16-frame videos (B*L = 32 rows keeps the
    # uint8 (32,128) sublane tiling exactly satisfied).
    B, L, C, H, W = 2, 16, 3, 16, 16
    F, D = 32, 8

    root = jax.random.PRNGKey(0)
    k_vid, k_par, k_vf = jax.random.split(root, 3)

    # Raw uint8 pixel videos, [B, L, C, H, W] (NCHW per frame).
    videos = jax.random.randint(
        k_vid, (B, L, C, H, W), 0, 256, dtype=jnp.int32).astype(jnp.uint8)
    params, ref_params = make_params(k_par, C, H, W, F, D)
    ref = reference_forward(videos, ref_params)

    # Faithful per-frame-encoding path.
    rewards = jax.block_until_ready(
        video_reward_forward(videos, params, pool_pixels_first=False))
    assert rewards.shape == (B, D), rewards.shape
    err = float(jnp.max(jnp.abs(rewards - ref)))
    assert jnp.allclose(rewards, ref, atol=5e-2, rtol=5e-2), f"max abs err {err}"

    # Linear-encoder fast path (pixels mean-pooled over L before the matmul).
    rewards_p = jax.block_until_ready(
        video_reward_forward(videos, params, pool_pixels_first=True))
    err_p = float(jnp.max(jnp.abs(rewards_p - ref)))
    assert jnp.allclose(rewards_p, ref, atol=5e-2, rtol=5e-2), f"max abs err {err_p}"

    # is_video_features=True path.
    vf = jax.random.normal(k_vf, (B, F), jnp.float32)
    r2 = jax.block_until_ready(
        video_reward_forward(vf, params, is_video_features=True))
    assert r2.shape == (B, D), r2.shape
    ref2 = vf @ ref_params["w_r"] + ref_params["b_r"][None, :]
    assert jnp.allclose(r2, ref2, atol=5e-2, rtol=5e-2)

    print("KERNEL_OK")
</pallas_src>

<mosaic_0001>
module attributes {stable_mosaic.version = 11 : i64} {
  func.func @kernel(%arg0: i32, %arg1: i32, %arg2: memref<32x768xi8, #tpu.memory_space<vmem>>, %arg3: memref<768x128xbf16, #tpu.memory_space<vmem>>, %arg4: memref<1x128xf32, #tpu.memory_space<vmem>>, %arg5: memref<128x128xbf16, #tpu.memory_space<vmem>>, %arg6: memref<1x128xf32, #tpu.memory_space<vmem>>, %arg7: memref<128x128xbf16, #tpu.memory_space<vmem>>, %arg8: memref<1x128xf32, #tpu.memory_space<vmem>>, %arg9: memref<2x128xf32, #tpu.memory_space<vmem>>, %arg10: memref<32x128xf32, #tpu.memory_space<vmem>>) attributes {dimension_semantics = [#tpu.dimension_semantics<parallel>, #tpu.dimension_semantics<arbitrary>], iteration_bounds = array<i64: 1, 1>, scalar_prefetch = 0 : i64, scratch_operands = 1 : i64, tpu.core_type = #tpu.core_type<tc>, window_params = [{transform_indices = @transform_0, window_bounds = array<i64: 32, 768>}, {transform_indices = @transform_1, window_bounds = array<i64: 768, 128>}, {pipeline_mode = #tpu.pipeline_mode<synchronous>, transform_indices = @transform_2, window_bounds = array<i64: 1, 128>}, {pipeline_mode = #tpu.pipeline_mode<synchronous>, transform_indices = @transform_3, window_bounds = array<i64: 128, 128>}, {pipeline_mode = #tpu.pipeline_mode<synchronous>, transform_indices = @transform_4, window_bounds = array<i64: 1, 128>}, {pipeline_mode = #tpu.pipeline_mode<synchronous>, transform_indices = @transform_5, window_bounds = array<i64: 128, 128>}, {pipeline_mode = #tpu.pipeline_mode<synchronous>, transform_indices = @transform_6, window_bounds = array<i64: 1, 128>}, {transform_indices = @transform_7, window_bounds = array<i64: 2, 128>}]} {
    %c0_i32 = arith.constant 0 : i32
    %0 = arith.cmpi eq, %arg1, %c0_i32 : i32
    %1 = arith.extui %0 : i1 to i32
    %c0_i32_0 = arith.constant 0 : i32
    %2 = arith.cmpi ne, %1, %c0_i32_0 : i32
    scf.if %2 {
      %cst_10 = arith.constant 0.000000e+00 : f32
      %13 = vector.broadcast %cst_10 : f32 to vector<32x128xf32>
      %c0_11 = arith.constant 0 : index
      %c0_12 = arith.constant 0 : index
      %14 = vector.load %arg10[%c0_11, %c0_12] : memref<32x128xf32, #tpu.memory_space<vmem>>, vector<32x128xf32>
      tpu.vector_store %arg10[%c0_11, %c0_12], %13 {strides = array<i32>} : memref<32x128xf32, #tpu.memory_space<vmem>>, vector<32x128xf32>,
    } else {
    }
    %c0 = arith.constant 0 : index
    %c0_1 = arith.constant 0 : index
    %3 = vector.load %arg2[%c0, %c0_1] : memref<32x768xi8, #tpu.memory_space<vmem>>, vector<32x768xi8>
    %4 = arith.uitofp %3 : vector<32x768xi8> to vector<32x768xbf16>
    %c0_2 = arith.constant 0 : index
    %c0_3 = arith.constant 0 : index
    %5 = vector.load %arg10[%c0_2, %c0_3] : memref<32x128xf32, #tpu.memory_space<vmem>>, vector<32x128xf32>
    %c0_4 = arith.constant 0 : index
    %c0_5 = arith.constant 0 : index
    %6 = vector.load %arg3[%c0_4, %c0_5] : memref<768x128xbf16, #tpu.memory_space<vmem>>, vector<768x128xbf16>
    %cst = arith.constant dense<0.000000e+00> : vector<32x128xf32>
    %7 = tpu.matmul %4, %6, %cst {dimension_numbers = #tpu.dot_dimension_numbers<[1], [0], [0], [1], [0, 0, 1, 1], [], []>} : vector<32x768xbf16>, vector<768x128xbf16>, vector<32x128xf32> -> vector<32x128xf32>
    %8 = arith.addf %5, %7 : vector<32x128xf32>
    %c0_6 = arith.constant 0 : index
    %c0_7 = arith.constant 0 : index
    %9 = vector.load %arg10[%c0_6, %c0_7] : memref<32x128xf32, #tpu.memory_space<vmem>>, vector<32x128xf32>
    tpu.vector_store %arg10[%c0_6, %c0_7], %8 {strides = array<i32>} : memref<32x128xf32, #tpu.memory_space<vmem>>, vector<32x128xf32>,
    %c0_i32_8 = arith.constant 0 : i32
    %10 = arith.cmpi eq, %arg1, %c0_i32_8 : i32
    %11 = arith.extui %10 : i1 to i32
    %c0_i32_9 = arith.constant 0 : i32
    %12 = arith.cmpi ne, %11, %c0_i32_9 : i32
    scf.if %12 {
      %c0_10 = arith.constant 0 : index
      %c0_11 = arith.constant 0 : index
      %13 = vector.load %arg10[%c0_10, %c0_11] : memref<32x128xf32, #tpu.memory_space<vmem>>, vector<32x128xf32>
      %c0_12 = arith.constant 0 : index
      %c0_13 = arith.constant 0 : index
      %14 = vector.load %arg4[%c0_12, %c0_13] : memref<1x128xf32, #tpu.memory_space<vmem>>, vector<1x128xf32>
      %15 = vector.broadcast %14 : vector<1x128xf32> to vector<32x128xf32>
      %16 = arith.addf %13, %15 : vector<32x128xf32>
      %17 = vector.shape_cast %16 : vector<32x128xf32> to vector<2x16x128xf32>
      %cst_14 = arith.constant dense<0.000000e+00> : vector<2x128xf32>
      %18 = vector.multi_reduction <add>, %17, %cst_14 [1] : vector<2x16x128xf32> to vector<2x128xf32>
      %cst_15 = arith.constant 1.600000e+01 : f32
      %19 = vector.broadcast %cst_15 : f32 to vector<2x128xf32>
      %20 = arith.divf %18, %19 : vector<2x128xf32>
      %c0_16 = arith.constant 0 : index
      %c0_17 = arith.constant 0 : index
      %21 = vector.load %arg5[%c0_16, %c0_17] : memref<128x128xbf16, #tpu.memory_space<vmem>>, vector<128x128xbf16>
      %cst_18 = arith.constant dense<0.000000e+00> : vector<2x128xf32>
      %22 = tpu.matmul %20, %21, %cst_18 {dimension_numbers = #tpu.dot_dimension_numbers<[1], [0], [0], [1], [0, 0, 1, 1], [], []>} : vector<2x128xf32>, vector<128x128xbf16>, vector<2x128xf32> -> vector<2x128xf32>
      %c0_19 = arith.constant 0 : index
      %c0_20 = arith.constant 0 : index
      %23 = vector.load %arg6[%c0_19, %c0_20] : memref<1x128xf32, #tpu.memory_space<vmem>>, vector<1x128xf32>
      %24 = vector.broadcast %23 : vector<1x128xf32> to vector<2x128xf32>
      %25 = arith.addf %22, %24 : vector<2x128xf32>
      %c0_21 = arith.constant 0 : index
      %c0_22 = arith.constant 0 : index
      %26 = vector.load %arg7[%c0_21, %c0_22] : memref<128x128xbf16, #tpu.memory_space<vmem>>, vector<128x128xbf16>
      %cst_23 = arith.constant dense<0.000000e+00> : vector<2x128xf32>
      %27 = tpu.matmul %25, %26, %cst_23 {dimension_numbers = #tpu.dot_dimension_numbers<[1], [0], [0], [1], [0, 0, 1, 1], [], []>} : vector<2x128xf32>, vector<128x128xbf16>, vector<2x128xf32> -> vector<2x128xf32>
      %c0_24 = arith.constant 0 : index
      %c0_25 = arith.constant 0 : index
      %28 = vector.load %arg8[%c0_24, %c0_25] : memref<1x128xf32, #tpu.memory_space<vmem>>, vector<1x128xf32>
      %29 = vector.broadcast %28 : vector<1x128xf32> to vector<2x128xf32>
      %30 = arith.addf %27, %29 : vector<2x128xf32>
      %c0_26 = arith.constant 0 : index
      %c0_27 = arith.constant 0 : index
      %31 = vector.load %arg9[%c0_26, %c0_27] : memref<2x128xf32, #tpu.memory_space<vmem>>, vector<2x128xf32>
      tpu.vector_store %arg9[%c0_26, %c0_27], %30 {strides = array<i32>} : memref<2x128xf32, #tpu.memory_space<vmem>>, vector<2x128xf32>,
    } else {
    }
    return
  }
  func.func @transform_0(%arg0: i32, %arg1: i32) -> (i32, i32) {
    %c0_i32 = arith.constant 0 : i32
    return %arg0, %arg1 : i32, i32
  }
  func.func @transform_1(%arg0: i32, %arg1: i32) -> (i32, i32) {
    %c0_i32 = arith.constant 0 : i32
    %c0_i32_0 = arith.constant 0 : i32
    return %arg1, %c0_i32 : i32, i32
  }
  func.func @transform_2(%arg0: i32, %arg1: i32) -> (i32, i32) {
    %c0_i32 = arith.constant 0 : i32
    %c0_i32_0 = arith.constant 0 : i32
    %c0_i32_1 = arith.constant 0 : i32
    return %c0_i32, %c0_i32_0 : i32, i32
  }
  func.func @transform_3(%arg0: i32, %arg1: i32) -> (i32, i32) {
    %c0_i32 = arith.constant 0 : i32
    %c0_i32_0 = arith.constant 0 : i32
    %c0_i32_1 = arith.constant 0 : i32
    return %c0_i32, %c0_i32_0 : i32, i32
  }
  func.func @transform_4(%arg0: i32, %arg1: i32) -> (i32, i32) {
    %c0_i32 = arith.constant 0 : i32
    %c0_i32_0 = arith.constant 0 : i32
    %c0_i32_1 = arith.constant 0 : i32
    return %c0_i32, %c0_i32_0 : i32, i32
  }
  func.func @transform_5(%arg0: i32, %arg1: i32) -> (i32, i32) {
    %c0_i32 = arith.constant 0 : i32
    %c0_i32_0 = arith.constant 0 : i32
    %c0_i32_1 = arith.constant 0 : i32
    return %c0_i32, %c0_i32_0 : i32, i32
  }
  func.func @transform_6(%arg0: i32, %arg1: i32) -> (i32, i32) {
    %c0_i32 = arith.constant 0 : i32
    %c0_i32_0 = arith.constant 0 : i32
    %c0_i32_1 = arith.constant 0 : i32
    return %c0_i32, %c0_i32_0 : i32, i32
  }
  func.func @transform_7(%arg0: i32, %arg1: i32) -> (i32, i32) {
    %c0_i32 = arith.constant 0 : i32
    %c0_i32_0 = arith.constant 0 : i32
    return %arg0, %c0_i32 : i32, i32
  }
}

</mosaic_0001>

<bundles_post_ra>
// kernel: tpu_custom_call.1
= control target key start
LH: loop header
LB: loop body
LE: loop exit
PB: predicated region body
PF: predicated region fallthrough
CT: control target
= control target key end

     0   :  { %12 = vsyncpa [#allocation4], 0  ;;  %s1396_s0 = inlined_call_operand.hbm [shape: u8[32,768], index: 0, kind: input, shape index: {}]   ;;  %s1397_s1 = inlined_call_operand.hbm [shape: bf16[768,128], index: 1, kind: input, shape index: {}]   ;;  %s1398_s2 = inlined_call_operand.vmem [shape: f32[1,128], index: 2, kind: input, shape index: {}]   ;;  %s1399_s3 = inlined_call_operand.hbm [shape: bf16[128,128], index: 3, kind: input, shape index: {}]   ;;  %s1400_s4 = inlined_call_operand.vmem [shape: f32[1,128], index: 4, kind: input, shape index: {}]   ;;  %s1401_s5 = inlined_call_operand.hbm [shape: bf16[128,128], index: 5, kind: input, shape index: {}]   ;;  %s1402_s6 = inlined_call_operand.vmem [shape: f32[1,128], index: 6, kind: input, shape index: {}]   ;;  %s1403_s7 = inlined_call_operand.hbm [shape: f32[2,128], index: 7, kind: output, shape index: {}]  }
   0x1   :  { %13 = vsyncpa [#allocation7], 0 }
   0x2   :  { %14 = vsyncpa [#allocation10], 0 }
   0x3   :  { %15 = vsyncpa [#allocation5], 0  ;;  %s1314_s24 = smov [#allocation6]  }
   0x4   :  { %s31_s25 = sshll.u32 %s1314_s24, 4  ;;  %s32_s25 = int_to_ptr.vmem [resolvable:$true] %s31_s25 }
   0x5   :  { %s1214_s26 = scalar_lea.vmem %s32_s25, 6144  ;;  %p1219_p1 = scmp.lt.s32.totalorder %s32_s25, %s32_s25 }
   0x6   :  { %p1215_p0 = scmp.ne.s32.totalorder %s32_s25, %s1214_s26  ;;  %p1220_p2 = scmp.lt.s32.totalorder %s1214_s26, %s1214_s26 }
   0x8   :  { %p1221_p3 = por %p1220_p2, %p1219_p1 }
   0xa   :  { %p1222_p4 = pnand %p1221_p3, %p1215_p0 }
   0xc   :  { %1225 = shalt.err (!%p1222_p4)
}
   0xd   :  { %s1315_s27 = smov 64   ;;  %s1316_s28 = smov 4  }
   0xe   :  { %37 = dma.hbm_to_vmem [thread:$0]  %s1397_s1, 6144, %s32_s25, [#allocation7], %s1315_s27, %s1315_s27, %s1316_s28  }
   0xf   :  { %s1317_s8 = smov [#allocation3]   ;;  %s1318_s10 = smov [#allocation8]  }
  0x10   :  { %s22_s9 = sshll.u32 %s1317_s8, 4  ;;  %s45_s11 = sshll.u32 %s1318_s10, 4  ;;  %s23_s9 = int_to_ptr.vmem [resolvable:$true] %s22_s9  ;;  %s46_s11 = int_to_ptr.vmem [resolvable:$true] %s45_s11 }
  0x11   :  { %s1234_s12 = scalar_lea.vmem %s23_s9, 768  ;;  %p1239_p6 = scmp.lt.s32.totalorder %s23_s9, %s23_s9 }
  0x12   :  { %p1235_p5 = scmp.ne.s32.totalorder %s23_s9, %s1234_s12  ;;  %p1240_p7 = scmp.lt.s32.totalorder %s1234_s12, %s1234_s12 }
  0x14   :  { %p1241_p8 = por %p1240_p7, %p1239_p6 }
  0x16   :  { %p1242_p9 = pnand %p1241_p8, %p1235_p5 }
  0x18   :  { %1245 = shalt.err (!%p1242_p9)
}
  0x19   :  { %25 = dma.hbm_to_vmem [thread:$0]  %s1396_s0, 768, %s23_s9, [#allocation4]  }
  0x1a   :  { %s1254_s15 = scalar_lea.vmem %s46_s11, 1024  ;;  %p1259_p11 = scmp.lt.s32.totalorder %s46_s11, %s46_s11 }
  0x1b   :  { %p1255_p10 = scmp.ne.s32.totalorder %s46_s11, %s1254_s15  ;;  %p1260_p12 = scmp.lt.s32.totalorder %s1254_s15, %s1254_s15 }
  0x1d   :  { %p1261_p13 = por %p1260_p12, %p1259_p11 }
  0x1f   :  { %p1262_p0 = pnand %p1261_p13, %p1255_p10 }
  0x21   :  { %1265 = shalt.err (!%p1262_p0)
}
  0x22   :  { %51 = dma.hbm_to_vmem [thread:$0]  %s1399_s3, 1024, %s46_s11, [#allocation7], %s1315_s27, %s1315_s27, %s1316_s28  }
  0x23   :  { %s1319_s17 = smov [#allocation9]  }
  0x24   :  { %s59_s18 = sshll.u32 %s1319_s17, 4  ;;  %s60_s18 = int_to_ptr.vmem [resolvable:$true] %s59_s18 }
  0x25   :  { %s1274_s19 = scalar_lea.vmem %s60_s18, 1024  ;;  %p1279_p2 = scmp.lt.s32.totalorder %s60_s18, %s60_s18 }
  0x26   :  { %p1275_p1 = scmp.ne.s32.totalorder %s60_s18, %s1274_s19  ;;  %p1280_p3 = scmp.lt.s32.totalorder %s1274_s19, %s1274_s19 }
  0x28   :  { %p1281_p4 = por %p1280_p3, %p1279_p2 }
  0x2a   :  { %p1282_p5 = pnand %p1281_p4, %p1275_p1 }
  0x2c   :  { %1285 = shalt.err (!%p1282_p5)
}
  0x2d   :  { %65 = dma.hbm_to_vmem [thread:$0]  %s1401_s5, 1024, %s60_s18, [#allocation10], %s1315_s27, %s1315_s27, %s1316_s28  }
  0x2e   :  { %1306 = dma.done.wait [#allocation4], 768  }
  0x2f   :  { %1307 = vsyncadd [#allocation4], 4294966528 }
  0x30   :  { %1308 = dma.done.wait [#allocation7], 7168  }
  0x31   :  { %1309 = vsyncadd [#allocation7], 4294960128 }
  0x32   :  { %1310 = dma.done.wait [#allocation10], 1024  }
  0x33   :  { %1311 = vsyncadd [#allocation10], 4294966272  ;;  %v1142_v0 = vld [vmem:[#allocation6 + $0x78] sm:$0xff]   ;;  %v1146_v4 = vld [vmem:[#allocation6 + $0x70] sm:$0xff]   ;;  %vm1321_vm0 = vmmov 0   ;;  %vm710_vm1 = vcmask 1041409  }
  0x34   :  { %v1143_v1 = vld [vmem:[#allocation6 + $0xf8] sm:$0xff]   ;;  %993 = vmatprep.subr.bf16.mxu0 %v1142_v0  ;;  %v1147_v5 = vld [vmem:[#allocation6 + $0xf0] sm:$0xff]   ;;  %v1150_v8 = vld [vmem:[#allocation6 + $0x68] sm:$0xff]   ;;  %s1322_s24 = smov [#allocation11]  }
  0x35   :  { %v1144_v2 = vld [vmem:[#allocation6 + $0x38] sm:$0xff]   ;;  %1021 = vmatprep.subr.bf16.mxu1 %v1143_v1  ;;  %v1148_v6 = vld [vmem:[#allocation6 + $0x30] sm:$0xff]   ;;  %v1151_v9 = vld [vmem:[#allocation6 + $0xe8] sm:$0xff]   ;;  %s915_s25 = sshll.u32 %s1322_s24, 4  ;;  %s916_s25 = int_to_ptr.vmem [resolvable:$true] %s915_s25 }
  0x36   :  { %v1145_v3 = vld [vmem:[#allocation6 + $0xb8] sm:$0xff]   ;;  %994 = vmatpush3.bf16.msra.mxu0 %v1144_v2  ;;  %v1149_v7 = vld [vmem:[#allocation6 + $0xb0] sm:$0xff]   ;;  %v1152_v10 = vld [vmem:[#allocation6 + $0x28] sm:$0xff]   ;;  %s1286_s26 = scalar_lea.vmem %s916_s25, 32  ;;  %p1291_p7 = scmp.lt.s32.totalorder %s916_s25, %s916_s25 }
  0x37   :  { %1022 = vmatpush3.bf16.msra.mxu1 %v1145_v3  ;;  %995 = vmatprep.subr.bf16.mxu0 %v1146_v4  ;;  %v1153_v11 = vld [vmem:[#allocation6 + $0xa8] sm:$0xff]   ;;  %v1154_v12 = vld [vmem:[#allocation6 + $0x60] sm:$0xff]   ;;  %v1158_v16 = vld [vmem:[#allocation6 + $0x58] sm:$0xff]   ;;  %v1320_v3 = vmov 0.0   ;;  %p1287_p6 = scmp.ne.s32.totalorder %s916_s25, %s1286_s26  ;;  %p1292_p8 = scmp.lt.s32.totalorder %s1286_s26, %s1286_s26 }
  0x38   :  { %1023 = vmatprep.subr.bf16.mxu1 %v1147_v5  ;;  %v1155_v13 = vld [vmem:[#allocation6 + $0xe0] sm:$0xff]   ;;  %v1159_v17 = vld [vmem:[#allocation6 + $0xd8] sm:$0xff]   ;;  %v1162_v20 = vld [vmem:[#allocation6 + $0x50] sm:$0xff]  }
  0x39   :  { %v1156_v14 = vld [vmem:[#allocation6 + $0x20] sm:$0xff]   ;;  %v1160_v18 = vld [vmem:[#allocation6 + $0x18] sm:$0xff]   ;;  %v1163_v21 = vld [vmem:[#allocation6 + $0xd0] sm:$0xff]   ;;  %p1293_p9 = por %p1292_p8, %p1291_p7 }
  0x3a   :  { %996 = vmatpush3.bf16.msra.mxu0 %v1148_v6  ;;  %v1157_v15 = vld [vmem:[#allocation6 + $0xa0] sm:$0xff]   ;;  %v1161_v19 = vld [vmem:[#allocation6 + $0x98] sm:$0xff]   ;;  %v1164_v22 = vld [vmem:[#allocation6 + $0x10] sm:$0xff]  }
  0x3b   :  { %1024 = vmatpush3.bf16.msra.mxu1 %v1149_v7  ;;  %997 = vmatprep.subr.bf16.mxu0 %v1150_v8  ;;  %v1165_v23 = vld [vmem:[#allocation6 + $0x90] sm:$0xff]   ;;  %v1166_v24 = vld [vmem:[#allocation6 + $0x48] sm:$0xff]   ;;  %v1170_v28 = vld [vmem:[#allocation6 + $0x40] sm:$0xff]   ;;  %p1294_p10 = pnand %p1293_p9, %p1287_p6 }
  0x3c   :  { %1025 = vmatprep.subr.bf16.mxu1 %v1151_v9  ;;  %v1167_v25 = vld [vmem:[#allocation6 + $0xc8] sm:$0xff]   ;;  %v1171_v29 = vld [vmem:[#allocation6 + $0xc0] sm:$0xff]   ;;  %v90_v32 = vld [vmem:[#allocation3 + $0x8] sm:$0xff] }
  0x3d   :  { %v1168_v26 = vld [vmem:[#allocation6 + $0x8] sm:$0xff]   ;;  %v1172_v30 = vld [vmem:[#allocation6] sm:$0xff]   ;;  %v89_v34 = vld [vmem:[#allocation3] sm:$0xff]  ;;  %v96_v35 = vunpack.c.l.u8.bf16 %v90_v32  ;;  %v102_v36 = vunpack.c.h.u8.bf16 %v90_v32 }
  0x3e   :  { %998 = vmatpush3.bf16.msra.mxu0 %v1152_v10  ;;  %v1169_v27 = vld [vmem:[#allocation6 + $0x88] sm:$0xff]   ;;  %v1173_v31 = vld [vmem:[#allocation6 + $0x80] sm:$0xff]   ;;  %v95_v40 = vunpack.c.l.u8.bf16 %v89_v34  ;;  %v1174_v42 = vld [vmem:[#allocation6 + $0x178] sm:$0xff]   ;;  %v101_v47 = vunpack.c.h.u8.bf16 %v89_v34 }
  0x3f   :  { %1026 = vmatpush3.bf16.msra.mxu1 %v1153_v11  ;;  %999 = vmatprep.subr.bf16.mxu0 %v1154_v12  ;;  %v92_v33 = vld [vmem:[#allocation3 + $0x18] sm:$0xff]  ;;  %v91_v38 = vld [vmem:[#allocation3 + $0x10] sm:$0xff]  ;;  %v1175_v43 = vld [vmem:[#allocation6 + $0x138] sm:$0xff]  }
  0x40   :  { %1027 = vmatprep.subr.bf16.mxu1 %v1155_v13  ;;  %v98_v37 = vunpack.c.l.u8.bf16 %v92_v33  ;;  %v104_v39 = vunpack.c.h.u8.bf16 %v92_v33  ;;  %v97_v41 = vunpack.c.l.u8.bf16 %v91_v38  ;;  %527 = vmatprep.mubr.bf16.mxu0 %v96_v35  ;;  %v1176_v44 = vld [vmem:[#allocation6 + $0x170] sm:$0xff]   ;;  %v1178_v46 = vld [vmem:[#allocation6 + $0x168] sm:$0xff]   ;;  %v103_v48 = vunpack.c.h.u8.bf16 %v91_v38  ;;  %v1180_v50 = vld [vmem:[#allocation6 + $0x160] sm:$0xff]  }
  0x41   :  { %v1177_v45 = vld [vmem:[#allocation6 + $0x130] sm:$0xff]   ;;  %v1179_v49 = vld [vmem:[#allocation6 + $0x128] sm:$0xff]   ;;  %v1181_v51 = vld [vmem:[#allocation6 + $0x120] sm:$0xff]  }
  0x42   :  { %1000 = vmatpush3.bf16.msra.mxu0 %v1156_v14  ;;  %576 = vmatprep.mubr.bf16.mxu1 %v98_v37  ;;  %v1182_v52 = vld [vmem:[#allocation6 + $0x158] sm:$0xff]   ;;  %v1184_v54 = vld [vmem:[#allocation6 + $0x150] sm:$0xff]   ;;  %v1186_v58 = vld [vmem:[#allocation6 + $0x148] sm:$0xff]  }
  0x43   :  { %1028 = vmatpush3.bf16.msra.mxu1 %v1157_v15  ;;  %1001 = vmatprep.subr.bf16.mxu0 %v1158_v16  ;;  %v1183_v53 = vld [vmem:[#allocation6 + $0x118] sm:$0xff]   ;;  %v1185_v57 = vld [vmem:[#allocation6 + $0x110] sm:$0xff]   ;;  %v1187_v59 = vld [vmem:[#allocation6 + $0x108] sm:$0xff]  }
  0x44   :  { %1029 = vmatprep.subr.bf16.mxu1 %v1159_v17  ;;  %v94_v55 = vld [vmem:[#allocation3 + $0x28] sm:$0xff]  ;;  %v1188_v60 = vld [vmem:[#allocation6 + $0x140] sm:$0xff]   ;;  %v93_v62 = vld [vmem:[#allocation3 + $0x20] sm:$0xff] }
  0x45   :  { %v100_v56 = vunpack.c.l.u8.bf16 %v94_v55  ;;  %v1189_v61 = vld [vmem:[#allocation6 + $0x100] sm:$0xff]   ;;  %v99_v63 = vunpack.c.l.u8.bf16 %v93_v62  ;;  %v106_v0 = vunpack.c.h.u8.bf16 %v94_v55  ;;  %v105_v1 = vunpack.c.h.u8.bf16 %v93_v62  ;;  %v1190_v2 = vld [vmem:[#allocation8 + $0x38] sm:$0xff]   ;;  %v1191_v4 = vld [vmem:[#allocation8 + $0x30] sm:$0xff]  }
  0x46   :  { %1002 = vmatpush3.bf16.msra.mxu0 %v1160_v18  ;;  %v1192_v5 = vld [vmem:[#allocation8 + $0x28] sm:$0xff]   ;;  %v1193_v6 = vld [vmem:[#allocation8 + $0x20] sm:$0xff]   ;;  %v1194_v7 = vld [vmem:[#allocation8 + $0x18] sm:$0xff]  }
  0x47   :  { %1030 = vmatpush3.bf16.msra.mxu1 %v1161_v19  ;;  %1003 = vmatprep.subr.bf16.mxu0 %v1162_v20  ;;  %v1195_v8 = vld [vmem:[#allocation8 + $0x10] sm:$0xff]   ;;  %v1196_v9 = vld [vmem:[#allocation8 + $0x8] sm:$0xff]   ;;  %v1197_v10 = vld [vmem:[#allocation8] sm:$0xff]  }
  0x48   :  { %1031 = vmatprep.subr.bf16.mxu1 %v1163_v21  ;;  %v1198_v11 = vld [vmem:[#allocation9 + $0x38] sm:$0xff]   ;;  %v1199_v12 = vld [vmem:[#allocation9 + $0x30] sm:$0xff]   ;;  %v1200_v13 = vld [vmem:[#allocation9 + $0x28] sm:$0xff]  }
  0x49   :  { %v1201_v14 = vld [vmem:[#allocation9 + $0x20] sm:$0xff]   ;;  %v1202_v15 = vld [vmem:[#allocation9 + $0x18] sm:$0xff]   ;;  %v1203_v16 = vld [vmem:[#allocation9 + $0x10] sm:$0xff]  }
  0x4a   :  { %1004 = vmatpush3.bf16.msra.mxu0 %v1164_v22  ;;  %v1204_v17 = vld [vmem:[#allocation9 + $0x8] sm:$0xff]  }
  0x4b   :  { %1032 = vmatpush3.bf16.msra.mxu1 %v1165_v23  ;;  %1005 = vmatprep.subr.bf16.mxu0 %v1166_v24 }
  0x4c   :  { %1033 = vmatprep.subr.bf16.mxu1 %v1167_v25 }
  0x4e   :  { %1006 = vmatpush3.bf16.msra.mxu0 %v1168_v26 }
  0x4f   :  { %1034 = vmatpush3.bf16.msra.mxu1 %v1169_v27  ;;  %1007 = vmatprep.subr.bf16.mxu0 %v1170_v28 }
  0x50   :  { %1035 = vmatprep.subr.bf16.mxu1 %v1171_v29 }
  0x52   :  { %1008 = vmatpush3.bf16.msra.mxu0 %v1172_v30 }
  0x53   :  { %1036 = vmatpush3.bf16.msra.mxu1 %v1173_v31  ;;  %1049 = vmatprep.subr.bf16.mxu0 %v1174_v42 }
  0x54   :  { %1095 = vmatprep.subr.bf16.mxu1 %v1320_v3 }
  0x55   :  { %528 = vmatmul.mubr.bf16.vlgmr.msra.gmra.mxu0 %v95_v40 }
  0x56   :  { %577 = vmatmul.mubr.bf16.vlgmr.msra.gmra.mxu1 %v97_v41  ;;  %535 = vmatprep.mubr.bf16.mxu0 %v102_v36 }
  0x57   :  { %1050 = vmatpush3.bf16.msra.mxu0 %v1175_v43  ;;  %584 = vmatprep.mubr.bf16.mxu1 %v104_v39 }
  0x58   :  { %1051 = vmatprep.subr.bf16.mxu0 %v1176_v44  ;;  %1096 = vmatpush3.bf16.msra.mxu1 %v1190_v2 }
  0x59   :  { %1097 = vmatprep.subr.bf16.mxu1 %v1320_v3 }
  0x5b   :  { %1052 = vmatpush3.bf16.msra.mxu0 %v1177_v45 }
  0x5c   :  { %1053 = vmatprep.subr.bf16.mxu0 %v1178_v46  ;;  %1098 = vmatpush3.bf16.msra.mxu1 %v1191_v4 }
  0x5d   :  { %536 = vmatmul.mubr.bf16.gmra.mxu0 %v101_v47  ;;  %1099 = vmatprep.subr.bf16.mxu1 %v1320_v3  ;;  %v974_v47 = vld [vmem:[%s1398_s2] ss:$0 sm:$0xff] }
  0x5e   :  { %585 = vmatmul.mubr.bf16.gmra.mxu1 %v103_v48  ;;  %625 = vmatprep.mubr.bf16.mxu0 %v100_v56 }
  0x5f   :  { %1054 = vmatpush3.bf16.msra.mxu0 %v1179_v49  ;;  %1111 = vmatprep.mubr.msk.f32.mxu1 %vm1321_vm0, %v1320_v3 }
  0x60   :  { %1055 = vmatprep.subr.bf16.mxu0 %v1180_v50  ;;  %1100 = vmatpush3.bf16.msra.mxu1 %v1192_v5 }
  0x61   :  { %1101 = vmatprep.subr.bf16.mxu1 %v1320_v3 }
  0x63   :  { %1056 = vmatpush3.bf16.msra.mxu0 %v1181_v51 }
  0x64   :  { %1057 = vmatprep.subr.bf16.mxu0 %v1182_v52  ;;  %1102 = vmatpush3.bf16.msra.mxu1 %v1193_v6 }
  0x65   :  { %1103 = vmatprep.subr.bf16.mxu1 %v1320_v3 }
  0x67   :  { %1058 = vmatpush3.bf16.msra.mxu0 %v1183_v53 }
  0x68   :  { %1059 = vmatprep.subr.bf16.mxu0 %v1184_v54  ;;  %1104 = vmatpush3.bf16.msra.mxu1 %v1194_v7 }
  0x69   :  { %1105 = vmatprep.subr.bf16.mxu1 %v1320_v3 }
  0x6b   :  { %1060 = vmatpush3.bf16.msra.mxu0 %v1185_v57 }
  0x6c   :  { %1061 = vmatprep.subr.bf16.mxu0 %v1186_v58  ;;  %1106 = vmatpush3.bf16.msra.mxu1 %v1195_v8 }
  0x6d   :  { %1107 = vmatprep.subr.bf16.mxu1 %v1320_v3 }
  0x6f   :  { %1062 = vmatpush3.bf16.msra.mxu0 %v1187_v59 }
  0x70   :  { %1063 = vmatprep.subr.bf16.mxu0 %v1188_v60  ;;  %1108 = vmatpush3.bf16.msra.mxu1 %v1196_v9 }
  0x71   :  { %1109 = vmatprep.subr.bf16.mxu1 %v1320_v3 }
  0x73   :  { %1064 = vmatpush3.bf16.msra.mxu0 %v1189_v61 }
  0x74   :  { %1114 = vmatprep.subr.bf16.mxu0 %v1320_v3  ;;  %1110 = vmatpush3.bf16.msra.mxu1 %v1197_v10 }
  0x76   :  { %626 = vmatmul.mubr.bf16.vlgmr.msra.gmra.mxu0 %v99_v63 }
  0x77   :  { %633 = vmatprep.mubr.bf16.mxu0 %v106_v0  ;;  %1115 = vmatpush3.bf16.msra.mxu0 %v1198_v11 }
  0x78   :  { %1116 = vmatprep.subr.bf16.mxu0 %v1320_v3 }
  0x7b   :  { %1117 = vmatpush3.bf16.msra.mxu0 %v1199_v12 }
  0x7c   :  { %1118 = vmatprep.subr.bf16.mxu0 %v1320_v3 }
  0x7e   :  { %634 = vmatmul.mubr.bf16.gmra.mxu0 %v105_v1 }
  0x7f   :  { %1130 = vmatprep.mubr.msk.f32.mxu0 %vm1321_vm0, %v1320_v3  ;;  %1119 = vmatpush3.bf16.msra.mxu0 %v1200_v13 }
  0x80   :  { %1120 = vmatprep.subr.bf16.mxu0 %v1320_v3 }
  0x83   :  { %1121 = vmatpush3.bf16.msra.mxu0 %v1201_v14 }
  0x84   :  { %1122 = vmatprep.subr.bf16.mxu0 %v1320_v3 }
  0x87   :  { %1123 = vmatpush3.bf16.msra.mxu0 %v1202_v15 }
  0x88   :  { %1124 = vmatprep.subr.bf16.mxu0 %v1320_v3 }
  0x8b   :  { %1125 = vmatpush3.bf16.msra.mxu0 %v1203_v16 }
  0x8c   :  { %1126 = vmatprep.subr.bf16.mxu0 %v1320_v3 }
  0x8f   :  { %1127 = vmatpush3.bf16.msra.mxu0 %v1204_v17 }
  0x90   :  { %1128 = vmatprep.subr.bf16.mxu0 %v1320_v3 }
 0x115   :  { %v1009_v18 = vpop.f32.mrf.mxu0 }
 0x116   :  { %v1037_v21 = vpop.f32.mrf.mxu1 }
 0x117   :  { %v1010_v19 = vpop.f32.mrf.mxu0 }
 0x118   :  { %v1038_v23 = vpop.f32.mrf.mxu1  ;;  %v1011_v33 = vadd.f32 %v1010_v19, %v1009_v18 }
 0x119   :  { %v1012_v20 = vpop.f32.mrf.mxu0  ;;  %v1039_v34 = vadd.f32 %v1038_v23, %v1037_v21  ;;  %v975_v21 = vld [vmem:[%s1400_s4] ss:$0 sm:$0xff] }
 0x11a   :  { %v1040_v25 = vpop.f32.mrf.mxu1 }
 0x11b   :  { %v1013_v22 = vpop.f32.mrf.mxu0  ;;  %v579_v41 = vadd.f32 %v1039_v34, %v1011_v33 }
 0x11c   :  { %v1041_v27 = vpop.f32.mrf.mxu1  ;;  %v1014_v36 = vadd.f32 %v1013_v22, %v1012_v20  ;;  %v1205_v20 = vld [vmem:[#allocation9] sm:$0xff]  }
 0x11d   :  { %v1015_v24 = vpop.f32.mrf.mxu0  ;;  %v1042_v37 = vadd.f32 %v1041_v27, %v1040_v25  ;;  %1129 = vmatpush3.bf16.msra.mxu0 %v1205_v20  ;;  %v984_v25 = vld [vmem:[%s1402_s6] ss:$0 sm:$0xff] }
 0x11e   :  { %v1043_v29 = vpop.f32.mrf.mxu1 }
 0x11f   :  { %v1016_v26 = vpop.f32.mrf.mxu0  ;;  %v582_v43 = vadd.f32 %v1042_v37, %v1014_v36 }
 0x120   :  { %v1044_v31 = vpop.f32.mrf.mxu1  ;;  %v1017_v49 = vadd.f32 %v1016_v26, %v1015_v24 }
 0x121   :  { %v1018_v28 = vpop.f32.mrf.mxu0  ;;  %v1045_v50 = vadd.f32 %v1044_v31, %v1043_v29 }
 0x122   :  { %v1046_v39 = vpop.f32.mrf.mxu1 }
 0x123   :  { %v1019_v30 = vpop.f32.mrf.mxu0  ;;  %v587_v59 = vadd.f32 %v1045_v50, %v1017_v49 }
 0x124   :  { %v1047_v46 = vpop.f32.mrf.mxu1  ;;  %v1020_v52 = vadd.f32 %v1019_v30, %v1018_v28 }
 0x125   :  { %v1048_v54 = vadd.f32 %v1047_v46, %v1046_v39 }
 0x127   :  { %v590_v62 = vadd.f32 %v1048_v54, %v1020_v52 }
 0x136   :  { %v1065_v32 = vpop.f32.mrf.mxu0 }
 0x138   :  { %v1066_v35 = vpop.f32.mrf.mxu0 }
 0x139   :  { %v1067_v38 = vadd.f32 %v1066_v35, %v1065_v32 }
 0x13a   :  { %v1068_v40 = vpop.f32.mrf.mxu0 }
 0x13b   :  { %v628_v44 = vadd.f32 %v1067_v38, %v579_v41 }
 0x13c   :  { %v1069_v42 = vpop.f32.mrf.mxu0 }
 0x13d   :  { %v1070_v45 = vadd.f32 %v1069_v42, %v1068_v40  ;;  %v664_v55 = vadd.f32 %v974_v47, %v628_v44 }
 0x13e   :  { %v1071_v48 = vpop.f32.mrf.mxu0 }
 0x13f   :  { %v631_v51 = vadd.f32 %v1070_v45, %v582_v43 }
 0x140   :  { %v1072_v53 = vpop.f32.mrf.mxu0 }
 0x141   :  { %v665_v56 = vadd.f32 %v974_v47, %v631_v51  ;;  %v1073_v57 = vadd.f32 %v1072_v53, %v1071_v48 }
 0x142   :  { %v1074_v58 = vpop.f32.mrf.mxu0 }
 0x143   :  { %v668_v60 = vadd.f32 %v665_v56, %v664_v55  ;;  %v636_v0 = vadd.f32 %v1073_v57, %v587_v59 }
 0x144   :  { %v1075_v61 = vpop.f32.mrf.mxu0 }
 0x145   :  { %v669_v63 = vrot.slane %v668_v60, 4  ;;  %v1076_v1 = vadd.f32 %v1075_v61, %v1074_v58  ;;  %v666_v5 = vadd.f32 %v974_v47, %v636_v0 }
 0x147   :  { %v670_v2 = vadd.f32 %v669_v63, %v668_v60  ;;  %v639_v3 = vadd.f32 %v1076_v1, %v590_v62 }
 0x149   :  { %v671_v4 = vrot.slane %v670_v2, 2  ;;  %v667_v6 = vadd.f32 %v974_v47, %v639_v3 }
 0x14b   :  { %v675_v7 = vadd.f32 %v667_v6, %v666_v5  ;;  %v672_v8 = vadd.f32 %v671_v4, %v670_v2 }
 0x14d   :  { %v676_v9 = vrot.slane %v675_v7, 4  ;;  %v673_v11 = vrot.slane %v672_v8, 1 }
 0x14f   :  { %v677_v10 = vadd.f32 %v676_v9, %v675_v7  ;;  %v674_v15 = vadd.f32 %v673_v11, %v672_v8 }
 0x151   :  { %v678_v12 = vrot.slane %v677_v10, 2  ;;  %v683_v17 = vmul.f32 0.0625, %v674_v15 }
 0x153   :  { %v679_v13 = vadd.f32 %v678_v12, %v677_v10 }
 0x155   :  { %v680_v14 = vrot.slane %v679_v13, 1 }
 0x157   :  { %v681_v16 = vadd.f32 %v680_v14, %v679_v13 }
 0x159   :  { %v684_v18 = vmul.f32 0.0625, %v681_v16 }
 0x15b   :  { %v711_v19 = vsel %vm710_vm1, %v684_v18, %v683_v17 }
 0x15c   :  { %1112 = vmatmul.mubr.f32.vlgmr.msra.gmra.mxu1 %v711_v19 }
 0x21c   :  { %v795_v22 = vpop.f32.mrf.mxu1 }
 0x21d   :  { %v796_v23 = vadd.f32 %v975_v21, %v795_v22 }
 0x21e   :  { %v1113_v24 = vpop.f32.mrf.mxu1 }
 0x21f   :  { %1131 = vmatmul.mubr.f32.vlgmr.msra.gmra.mxu0 %v796_v23 }
 0x2df   :  { %v904_v26 = vpop.f32.mrf.mxu0 }
 0x2e0   :  { %v905_v27 = vadd.f32 %v984_v25, %v904_v26 }
 0x2e1   :  { %v1132_v28 = vpop.f32.mrf.mxu0 }
 0x2e2   :  { %908 = vst [vmem:[#allocation11] sm:$0x3] %v905_v27 }
 0x2e3   :  { %1297 = shalt.err (!%p1294_p10)
}
 0x2e4   :  { %918 = dma.vmem_to_hbm [thread:$0]  %s916_s25, 32, %s1403_s7, [#allocation5]  }
 0x2e5   :  { %1312 = dma.done.wait [#allocation5], 32  }
 0x2e6   :  { %1313 = vsyncadd [#allocation5], 4294967264 }
 0x2e7   :  { %922 = vsyncpa [#allocation4], 1 }
 0x2e8   :  { %923 = vsyncpa [#allocation7], 1 }
 0x2e9   :  { %924 = vsyncpa [#allocation10], 1 }
 0x2ea   :  { %925 = vsyncpa [#allocation5], 1 }

</bundles_post_ra>
